<compile_context>
chip_gen: v5e
topology: v5e:2x2
jax: 0.10.0
libtpu: 0.0.40
codegen_flags: <defaults>
</compile_context>

<pallas_src>
import math
from functools import partial

import jax
import jax.numpy as jnp
from jax.experimental import pallas as pl
from jax.experimental.pallas import tpu as pltpu

BN_EPS = 1e-5       # torch.nn.BatchNorm1d default eps
NORM_EPS = 1e-12    # torch.nn.functional.normalize default eps


def _round_up(x, m):
    return ((x + m - 1) // m) * m


def _vmem_limit_bytes(resident_estimate):
    """Clamp the scoped-VMEM request to the chip's real capacity (minus
    headroom) and ~2x of the actual resident estimate."""
    try:
        cap = int(pltpu.get_tpu_info().vmem_capacity_bytes)
    except Exception:  # pragma: no cover - conservative fallback (v7x per-TC)
        cap = 64 * 2**20
    hi = max(16 * 2**20, cap - 8 * 2**20)
    return int(min(hi, max(16 * 2**20, 2 * int(resident_estimate))))


# ---------------------------------------------------------------------------
# Kernel 1: projector (Linear -> BN -> ReLU -> Linear), L2 normalize,
# positive-pair logit sum. Single grid point; output goes to HBM so the
# (parallel) similarity kernel's grid can be split across TensorCores.
# TODO(synk): tile this stage too (two-pass BN statistics) if N*IN outgrows
# VMEM for production feature widths.
# ---------------------------------------------------------------------------
def _projector_kernel(x1_ref, x2_ref, w1_ref, b1_ref, gamma_ref, beta_ref,
                      w2_ref, b2_ref, out_ref, pos_ref, *, inv_t):
    n = x1_ref.shape[0]
    two_n = 2 * n
    mm_dtype = w1_ref.dtype

    w1 = w1_ref[...]
    w2 = w2_ref[...]
    b1 = b1_ref[...]
    gamma = gamma_ref[...]
    beta = beta_ref[...]
    b2 = b2_ref[...]

    def project_half(x):
        # Linear 1 (MXU, f32 accumulation).
        h = jnp.dot(x, w1, preferred_element_type=jnp.float32) + b1
        # BatchNorm1d training-mode batch stats, computed per view (PyTorch
        # runs the projector on each view separately) - plain per-half math,
        # no (2N, OUT) broadcast/select blend.
        mu = jnp.mean(h, axis=0, keepdims=True)
        var = jnp.mean((h - mu) * (h - mu), axis=0, keepdims=True)
        h = (h - mu) * jax.lax.rsqrt(var + BN_EPS) * gamma + beta
        h = jnp.maximum(h, 0.0)                              # ReLU
        # Linear 2 (MXU).
        z = jnp.dot(h.astype(mm_dtype), w2,
                    preferred_element_type=jnp.float32) + b2
        # L2 normalize per row (rsqrt -> EUP); max(ss, eps^2) == max(||z||, eps).
        ss = jnp.sum(z * z, axis=1, keepdims=True)
        return z * jax.lax.rsqrt(jnp.maximum(ss, NORM_EPS * NORM_EPS))

    out1 = project_half(x1_ref[...])        # (N, OUT_pad) f32
    out2 = project_half(x2_ref[...])        # (N, OUT_pad) f32

    # Positive-pair logit sum: log(exp(s)) == s, so no exp/log is needed; the
    # "repeated twice" mean is handled in the wrapper.
    pos_ref[...] = jnp.sum(jnp.sum(out1 * out2, axis=1, keepdims=True),
                           axis=0, keepdims=True) * inv_t

    out_ref[pl.ds(0, n), :] = out1.astype(out_ref.dtype)
    out_ref[pl.ds(n, n), :] = out2.astype(out_ref.dtype)
    pad = out_ref.shape[0] - two_n
    if pad > 0:
        # Zero key rows contribute exp(0/tem) == 1 per real query row; the
        # similarity kernel subtracts that constant exactly.
        out_ref[pl.ds(two_n, pad), :] = jnp.zeros(
            (pad, out_ref.shape[1]), out_ref.dtype)


# ---------------------------------------------------------------------------
# Kernel 2: flash-style tiled similarity row sums.
# Grid over query-row blocks; the full (2N_pad, OUT_pad) key slab stays
# resident (constant index_map -> fetched once), the exp/log of each block
# overlaps the next block's MXU matmul via BlockSpec pipelining.
# ---------------------------------------------------------------------------
def _similarity_kernel(q_ref, k_ref, o_ref, *, inv_t, pad_rows):
    q = q_ref[...]
    # (TQ, 2N_pad) logits; contracting dims (1,1) -> no materialized transpose.
    s = jax.lax.dot_general(q, k_ref[...], (((1,), (1,)), ((), ())),
                            preferred_element_type=jnp.float32) * inv_t
    e = jnp.exp(s)                                            # EUP-bound stage
    # Per-row self-similarity (diagonal) computed from the same (possibly bf16)
    # operands the MXU sees, so the subtraction tracks e[i, i] closely.
    qf = q.astype(jnp.float32)
    self_sim = jnp.exp(jnp.sum(qf * qf, axis=1, keepdims=True) * inv_t)
    # TODO(synk): if profiling shows the XLU lane reduction as the binding
    # slot, compute the row sums as e @ ones on the (otherwise idle) MXU.
    rowsum = jnp.sum(e, axis=1, keepdims=True) - self_sim - float(pad_rows)
    o_ref[...] = jnp.log(rowsum)


# ---------------------------------------------------------------------------
# Wrapper
# ---------------------------------------------------------------------------
def ucl_loss(doc_fea, doc_fea_svd, params, temperature=0.5,
             matmul_dtype=jnp.bfloat16, block_q=256):
    """Pallas UCL forward. matmul_dtype=bfloat16 feeds the MXU in bf16 with
    f32 accumulation (fast path on v6e/v7x); BN/exp/log/loss math stays f32."""
    w1, b1, gamma, beta, w2, b2 = params
    n, in_fea = doc_fea.shape
    out_fea = w1.shape[1]
    two_n = 2 * n
    inv_t = 1.0 / float(temperature)
    f32 = jnp.float32

    # Lane-pad OUT to a multiple of 128: zero columns are inert for the
    # matmuls, BN (gamma/beta padded with 0), ReLU, the L2 norm and the dots.
    out_pad = _round_up(out_fea, 128)
    pc = out_pad - out_fea
    w1p = jnp.pad(w1, ((0, 0), (0, pc))).astype(matmul_dtype)
    w2p = jnp.pad(w2, ((0, pc), (0, pc))).astype(matmul_dtype)
    b1p = jnp.pad(b1.astype(f32), (0, pc))[None, :]
    gp = jnp.pad(gamma.astype(f32), (0, pc))[None, :]
    bp = jnp.pad(beta.astype(f32), (0, pc))[None, :]
    b2p = jnp.pad(b2.astype(f32), (0, pc))[None, :]

    x1 = doc_fea.astype(matmul_dtype)
    x2 = doc_fea_svd.astype(matmul_dtype)

    # Query-row tiling of the similarity stage.
    if two_n <= block_q:
        tq = max(8, _round_up(two_n, 8))
        two_n_pad = tq
    else:
        tq = block_q                     # multiple of 8 (and of 128 by default)
        two_n_pad = _round_up(two_n, tq)
    pad_rows = two_n_pad - two_n
    num_blocks = two_n_pad // tq

    itemsize = jnp.dtype(matmul_dtype).itemsize

    # ---- kernel 1: projector --------------------------------------------
    est1 = (2 * n * in_fea * itemsize
            + (in_fea + out_pad) * out_pad * itemsize
            + 4 * out_pad * 4
            + 8 * n * out_pad * 4
            + two_n_pad * out_pad * itemsize)
    proj_cost = pl.CostEstimate(
        flops=int(2 * two_n * (in_fea + out_pad) * out_pad
                  + 12 * two_n * out_pad),
        transcendentals=int(3 * two_n),
        bytes_accessed=int(est1))

    out_stacked, pos_sum = pl.pallas_call(
        partial(_projector_kernel, inv_t=inv_t),
        out_shape=(jax.ShapeDtypeStruct((two_n_pad, out_pad), matmul_dtype),
                   jax.ShapeDtypeStruct((1, 1), jnp.float32)),
        in_specs=[pl.BlockSpec(memory_space=pltpu.MemorySpace.VMEM)] * 8,
        out_specs=(pl.BlockSpec(memory_space=pltpu.MemorySpace.VMEM),
                   pl.BlockSpec(memory_space=pltpu.MemorySpace.VMEM)),
        cost_estimate=proj_cost,
        compiler_params=pltpu.CompilerParams(
            vmem_limit_bytes=_vmem_limit_bytes(est1)),
    )(x1, x2, w1p, b1p, gp, bp, w2p, b2p)

    # ---- kernel 2: tiled similarity row sums -----------------------------
    est2 = (two_n_pad * out_pad * itemsize        # resident key slab
            + 2 * tq * out_pad * itemsize         # double-buffered query block
            + 2 * tq * two_n_pad * 4              # logits / exp intermediate
            + 2 * tq * 4)                          # output blocks
    sim_cost = pl.CostEstimate(
        flops=int(2 * two_n_pad * two_n_pad * out_pad
                  + 4 * two_n_pad * two_n_pad),
        transcendentals=int(two_n_pad * two_n_pad + 2 * two_n_pad),
        bytes_accessed=int(2 * two_n_pad * out_pad * itemsize + two_n_pad * 4))

    log_rowsum = pl.pallas_call(
        partial(_similarity_kernel, inv_t=inv_t, pad_rows=pad_rows),
        out_shape=jax.ShapeDtypeStruct((two_n_pad, 1), jnp.float32),
        grid_spec=pltpu.PrefetchScalarGridSpec(
            num_scalar_prefetch=0,
            grid=(num_blocks,),
            in_specs=[pl.BlockSpec((tq, out_pad), lambda i: (i, 0)),
                      pl.BlockSpec((two_n_pad, out_pad), lambda i: (0, 0))],
            out_specs=pl.BlockSpec((tq, 1), lambda i: (i, 0))),
        cost_estimate=sim_cost,
        compiler_params=pltpu.CompilerParams(
            dimension_semantics=("parallel",),
            vmem_limit_bytes=_vmem_limit_bytes(est2)),
    )(out_stacked, out_stacked)

    # loss = mean_i log(rowsum_i)  -  mean_i pos_logit_i   (pos repeated twice,
    # so the mean over 2N of the repeated logits is sum(pos_logit)/N).
    mean_log = jnp.mean(log_rowsum[:two_n, 0])
    return mean_log - pos_sum[0, 0] / n


def ucl_loss_reference(doc_fea, doc_fea_svd, params, temperature=0.5):
    """Pure-JAX reference mirroring the PyTorch forward, for validation."""
    w1, b1, gamma, beta, w2, b2 = params

    def projector(x):
        h = x @ w1 + b1
        mu = jnp.mean(h, axis=0)
        var = jnp.mean((h - mu) ** 2, axis=0)
        h = (h - mu) / jnp.sqrt(var + BN_EPS) * gamma + beta
        h = jnp.maximum(h, 0.0)
        return h @ w2 + b2

    def normalize(z):
        nrm = jnp.linalg.norm(z, axis=1, keepdims=True)
        return z / jnp.maximum(nrm, NORM_EPS)

    out1 = normalize(projector(doc_fea))
    out2 = normalize(projector(doc_fea_svd))
    out = jnp.concatenate([out1, out2], axis=0)
    dim = out.shape[0]
    sim = jnp.exp(out @ out.T / temperature)
    mask = ~jnp.eye(dim, dtype=bool)
    sim = sim[mask].reshape(dim, dim - 1)
    pos = jnp.exp(jnp.sum(out1 * out2, axis=-1) / temperature)
    pos = jnp.concatenate([pos, pos], axis=0)
    return jnp.mean(-jnp.log(pos / jnp.sum(sim, axis=-1)))


if __name__ == "__main__":
    N, IN_FEA, OUT_FEA = 8, 32, 32
    TEM = 0.5

    key = jax.random.PRNGKey(0)
    k_doc, k_svd, k_w1, k_b1, k_w2, k_b2 = jax.random.split(key, 6)

    doc_fea = jax.random.normal(k_doc, (N, IN_FEA), dtype=jnp.float32)
    doc_fea_svd = jax.random.normal(k_svd, (N, IN_FEA), dtype=jnp.float32)

    # Parameters (weights already in (in_features, out_features) layout).
    w1 = jax.random.normal(k_w1, (IN_FEA, OUT_FEA), dtype=jnp.float32) * 0.1
    b1 = jax.random.normal(k_b1, (OUT_FEA,), dtype=jnp.float32) * 0.1
    gamma = jnp.ones((OUT_FEA,), dtype=jnp.float32)
    beta = jnp.zeros((OUT_FEA,), dtype=jnp.float32)
    w2 = jax.random.normal(k_w2, (OUT_FEA, OUT_FEA), dtype=jnp.float32) * 0.1
    b2 = jax.random.normal(k_b2, (OUT_FEA,), dtype=jnp.float32) * 0.1
    params = (w1, b1, gamma, beta, w2, b2)

    ref = ucl_loss_reference(doc_fea, doc_fea_svd, params, temperature=TEM)

    # f32 MXU path: tight check against the PyTorch-equivalent reference.
    loss_f32 = jax.block_until_ready(
        ucl_loss(doc_fea, doc_fea_svd, params, temperature=TEM,
                 matmul_dtype=jnp.float32))
    assert jnp.isfinite(loss_f32), "f32 kernel produced non-finite loss"
    assert jnp.allclose(loss_f32, ref, rtol=1e-4, atol=1e-4), (loss_f32, ref)

    # bf16 MXU path (fast path on v6e/v7x): looser tolerance (bf16 operands).
    loss_bf16 = jax.block_until_ready(
        ucl_loss(doc_fea, doc_fea_svd, params, temperature=TEM,
                 matmul_dtype=jnp.bfloat16))
    assert jnp.isfinite(loss_bf16), "bf16 kernel produced non-finite loss"
    assert jnp.allclose(loss_bf16, ref, rtol=5e-2, atol=5e-2), (loss_bf16, ref)

    print("KERNEL_OK")
</pallas_src>

<mosaic_0001>
module attributes {stable_mosaic.version = 11 : i64} {
  func.func @_projector_kernel(%arg0: memref<8x32xf32, #tpu.memory_space<vmem>>, %arg1: memref<8x32xf32, #tpu.memory_space<vmem>>, %arg2: memref<32x128xf32, #tpu.memory_space<vmem>>, %arg3: memref<1x128xf32, #tpu.memory_space<vmem>>, %arg4: memref<1x128xf32, #tpu.memory_space<vmem>>, %arg5: memref<1x128xf32, #tpu.memory_space<vmem>>, %arg6: memref<128x128xf32, #tpu.memory_space<vmem>>, %arg7: memref<1x128xf32, #tpu.memory_space<vmem>>, %arg8: memref<16x128xf32, #tpu.memory_space<vmem>>, %arg9: memref<1x1xf32, #tpu.memory_space<vmem>>) attributes {dimension_semantics = [], scalar_prefetch = 0 : i64, scratch_operands = 0 : i64, tpu.core_type = #tpu.core_type<tc>} {
    %c0 = arith.constant 0 : index
    %c0_0 = arith.constant 0 : index
    %0 = vector.load %arg2[%c0, %c0_0] : memref<32x128xf32, #tpu.memory_space<vmem>>, vector<32x128xf32>
    %c0_1 = arith.constant 0 : index
    %c0_2 = arith.constant 0 : index
    %1 = vector.load %arg6[%c0_1, %c0_2] : memref<128x128xf32, #tpu.memory_space<vmem>>, vector<128x128xf32>
    %c0_3 = arith.constant 0 : index
    %c0_4 = arith.constant 0 : index
    %2 = vector.load %arg3[%c0_3, %c0_4] : memref<1x128xf32, #tpu.memory_space<vmem>>, vector<1x128xf32>
    %c0_5 = arith.constant 0 : index
    %c0_6 = arith.constant 0 : index
    %3 = vector.load %arg4[%c0_5, %c0_6] : memref<1x128xf32, #tpu.memory_space<vmem>>, vector<1x128xf32>
    %c0_7 = arith.constant 0 : index
    %c0_8 = arith.constant 0 : index
    %4 = vector.load %arg5[%c0_7, %c0_8] : memref<1x128xf32, #tpu.memory_space<vmem>>, vector<1x128xf32>
    %c0_9 = arith.constant 0 : index
    %c0_10 = arith.constant 0 : index
    %5 = vector.load %arg7[%c0_9, %c0_10] : memref<1x128xf32, #tpu.memory_space<vmem>>, vector<1x128xf32>
    %c0_11 = arith.constant 0 : index
    %c0_12 = arith.constant 0 : index
    %6 = vector.load %arg0[%c0_11, %c0_12] : memref<8x32xf32, #tpu.memory_space<vmem>>, vector<8x32xf32>
    %cst = arith.constant dense<0.000000e+00> : vector<8x128xf32>
    %7 = tpu.matmul %6, %0, %cst {dimension_numbers = #tpu.dot_dimension_numbers<[1], [0], [0], [1], [0, 0, 1, 1], [], []>} : vector<8x32xf32>, vector<32x128xf32>, vector<8x128xf32> -> vector<8x128xf32>
    %8 = vector.broadcast %2 : vector<1x128xf32> to vector<8x128xf32>
    %9 = arith.addf %7, %8 : vector<8x128xf32>
    %cst_13 = arith.constant dense<0.000000e+00> : vector<128xf32>
    %10 = vector.multi_reduction <add>, %9, %cst_13 [0] : vector<8x128xf32> to vector<128xf32>
    %11 = vector.shape_cast %10 : vector<128xf32> to vector<1x128xf32>
    %cst_14 = arith.constant 8.000000e+00 : f32
    %12 = vector.broadcast %cst_14 : f32 to vector<1x128xf32>
    %13 = arith.divf %11, %12 : vector<1x128xf32>
    %14 = vector.broadcast %13 : vector<1x128xf32> to vector<8x128xf32>
    %15 = arith.subf %9, %14 : vector<8x128xf32>
    %16 = vector.broadcast %13 : vector<1x128xf32> to vector<8x128xf32>
    %17 = arith.subf %9, %16 : vector<8x128xf32>
    %18 = arith.mulf %15, %17 : vector<8x128xf32>
    %cst_15 = arith.constant dense<0.000000e+00> : vector<128xf32>
    %19 = vector.multi_reduction <add>, %18, %cst_15 [0] : vector<8x128xf32> to vector<128xf32>
    %20 = vector.shape_cast %19 : vector<128xf32> to vector<1x128xf32>
    %cst_16 = arith.constant 8.000000e+00 : f32
    %21 = vector.broadcast %cst_16 : f32 to vector<1x128xf32>
    %22 = arith.divf %20, %21 : vector<1x128xf32>
    %23 = vector.broadcast %13 : vector<1x128xf32> to vector<8x128xf32>
    %24 = arith.subf %9, %23 : vector<8x128xf32>
    %cst_17 = arith.constant 9.99999974E-6 : f32
    %25 = vector.broadcast %cst_17 : f32 to vector<1x128xf32>
    %26 = arith.addf %22, %25 : vector<1x128xf32>
    %27 = math.rsqrt %26 : vector<1x128xf32>
    %28 = vector.broadcast %27 : vector<1x128xf32> to vector<8x128xf32>
    %29 = arith.mulf %24, %28 : vector<8x128xf32>
    %30 = vector.broadcast %3 : vector<1x128xf32> to vector<8x128xf32>
    %31 = arith.mulf %29, %30 : vector<8x128xf32>
    %32 = vector.broadcast %4 : vector<1x128xf32> to vector<8x128xf32>
    %33 = arith.addf %31, %32 : vector<8x128xf32>
    %cst_18 = arith.constant 0.000000e+00 : f32
    %34 = vector.broadcast %cst_18 : f32 to vector<8x128xf32>
    %35 = arith.maximumf %33, %34 : vector<8x128xf32>
    %cst_19 = arith.constant dense<0.000000e+00> : vector<8x128xf32>
    %36 = tpu.matmul %35, %1, %cst_19 {dimension_numbers = #tpu.dot_dimension_numbers<[1], [0], [0], [1], [0, 0, 1, 1], [], []>} : vector<8x128xf32>, vector<128x128xf32>, vector<8x128xf32> -> vector<8x128xf32>
    %37 = vector.broadcast %5 : vector<1x128xf32> to vector<8x128xf32>
    %38 = arith.addf %36, %37 : vector<8x128xf32>
    %39 = arith.mulf %38, %38 : vector<8x128xf32>
    %cst_20 = arith.constant dense<0.000000e+00> : vector<8xf32>
    %40 = vector.multi_reduction <add>, %39, %cst_20 [1] : vector<8x128xf32> to vector<8xf32>
    %41 = vector.shape_cast %40 : vector<8xf32> to vector<8x1xf32>
    %cst_21 = arith.constant 1.000000e-24 : f32
    %42 = vector.broadcast %cst_21 : f32 to vector<8x1xf32>
    %43 = arith.maximumf %41, %42 : vector<8x1xf32>
    %44 = math.rsqrt %43 : vector<8x1xf32>
    %45 = vector.broadcast %44 : vector<8x1xf32> to vector<8x128xf32>
    %46 = arith.mulf %38, %45 : vector<8x128xf32>
    %c0_22 = arith.constant 0 : index
    %c0_23 = arith.constant 0 : index
    %47 = vector.load %arg1[%c0_22, %c0_23] : memref<8x32xf32, #tpu.memory_space<vmem>>, vector<8x32xf32>
    %cst_24 = arith.constant dense<0.000000e+00> : vector<8x128xf32>
    %48 = tpu.matmul %47, %0, %cst_24 {dimension_numbers = #tpu.dot_dimension_numbers<[1], [0], [0], [1], [0, 0, 1, 1], [], []>} : vector<8x32xf32>, vector<32x128xf32>, vector<8x128xf32> -> vector<8x128xf32>
    %49 = vector.broadcast %2 : vector<1x128xf32> to vector<8x128xf32>
    %50 = arith.addf %48, %49 : vector<8x128xf32>
    %cst_25 = arith.constant dense<0.000000e+00> : vector<128xf32>
    %51 = vector.multi_reduction <add>, %50, %cst_25 [0] : vector<8x128xf32> to vector<128xf32>
    %52 = vector.shape_cast %51 : vector<128xf32> to vector<1x128xf32>
    %cst_26 = arith.constant 8.000000e+00 : f32
    %53 = vector.broadcast %cst_26 : f32 to vector<1x128xf32>
    %54 = arith.divf %52, %53 : vector<1x128xf32>
    %55 = vector.broadcast %54 : vector<1x128xf32> to vector<8x128xf32>
    %56 = arith.subf %50, %55 : vector<8x128xf32>
    %57 = vector.broadcast %54 : vector<1x128xf32> to vector<8x128xf32>
    %58 = arith.subf %50, %57 : vector<8x128xf32>
    %59 = arith.mulf %56, %58 : vector<8x128xf32>
    %cst_27 = arith.constant dense<0.000000e+00> : vector<128xf32>
    %60 = vector.multi_reduction <add>, %59, %cst_27 [0] : vector<8x128xf32> to vector<128xf32>
    %61 = vector.shape_cast %60 : vector<128xf32> to vector<1x128xf32>
    %cst_28 = arith.constant 8.000000e+00 : f32
    %62 = vector.broadcast %cst_28 : f32 to vector<1x128xf32>
    %63 = arith.divf %61, %62 : vector<1x128xf32>
    %64 = vector.broadcast %54 : vector<1x128xf32> to vector<8x128xf32>
    %65 = arith.subf %50, %64 : vector<8x128xf32>
    %cst_29 = arith.constant 9.99999974E-6 : f32
    %66 = vector.broadcast %cst_29 : f32 to vector<1x128xf32>
    %67 = arith.addf %63, %66 : vector<1x128xf32>
    %68 = math.rsqrt %67 : vector<1x128xf32>
    %69 = vector.broadcast %68 : vector<1x128xf32> to vector<8x128xf32>
    %70 = arith.mulf %65, %69 : vector<8x128xf32>
    %71 = vector.broadcast %3 : vector<1x128xf32> to vector<8x128xf32>
    %72 = arith.mulf %70, %71 : vector<8x128xf32>
    %73 = vector.broadcast %4 : vector<1x128xf32> to vector<8x128xf32>
    %74 = arith.addf %72, %73 : vector<8x128xf32>
    %cst_30 = arith.constant 0.000000e+00 : f32
    %75 = vector.broadcast %cst_30 : f32 to vector<8x128xf32>
    %76 = arith.maximumf %74, %75 : vector<8x128xf32>
    %cst_31 = arith.constant dense<0.000000e+00> : vector<8x128xf32>
    %77 = tpu.matmul %76, %1, %cst_31 {dimension_numbers = #tpu.dot_dimension_numbers<[1], [0], [0], [1], [0, 0, 1, 1], [], []>} : vector<8x128xf32>, vector<128x128xf32>, vector<8x128xf32> -> vector<8x128xf32>
    %78 = vector.broadcast %5 : vector<1x128xf32> to vector<8x128xf32>
    %79 = arith.addf %77, %78 : vector<8x128xf32>
    %80 = arith.mulf %79, %79 : vector<8x128xf32>
    %cst_32 = arith.constant dense<0.000000e+00> : vector<8xf32>
    %81 = vector.multi_reduction <add>, %80, %cst_32 [1] : vector<8x128xf32> to vector<8xf32>
    %82 = vector.shape_cast %81 : vector<8xf32> to vector<8x1xf32>
    %cst_33 = arith.constant 1.000000e-24 : f32
    %83 = vector.broadcast %cst_33 : f32 to vector<8x1xf32>
    %84 = arith.maximumf %82, %83 : vector<8x1xf32>
    %85 = math.rsqrt %84 : vector<8x1xf32>
    %86 = vector.broadcast %85 : vector<8x1xf32> to vector<8x128xf32>
    %87 = arith.mulf %79, %86 : vector<8x128xf32>
    %88 = arith.mulf %46, %87 : vector<8x128xf32>
    %cst_34 = arith.constant dense<0.000000e+00> : vector<8xf32>
    %89 = vector.multi_reduction <add>, %88, %cst_34 [1] : vector<8x128xf32> to vector<8xf32>
    %90 = vector.shape_cast %89 : vector<8xf32> to vector<8x1xf32>
    %cst_35 = arith.constant dense<0.000000e+00> : vector<1xf32>
    %91 = vector.multi_reduction <add>, %90, %cst_35 [0] : vector<8x1xf32> to vector<1xf32>
    %92 = vector.shape_cast %91 : vector<1xf32> to vector<1x1xf32>
    %cst_36 = arith.constant 2.000000e+00 : f32
    %93 = vector.broadcast %cst_36 : f32 to vector<1x1xf32>
    %94 = arith.mulf %92, %93 : vector<1x1xf32>
    %c0_37 = arith.constant 0 : index
    %c0_38 = arith.constant 0 : index
    %95 = vector.load %arg9[%c0_37, %c0_38] : memref<1x1xf32, #tpu.memory_space<vmem>>, vector<1x1xf32>
    tpu.vector_store %arg9[%c0_37, %c0_38], %94 {strides = array<i32>} : memref<1x1xf32, #tpu.memory_space<vmem>>, vector<1x1xf32>,
    %c0_39 = arith.constant 0 : index
    %c0_40 = arith.constant 0 : index
    %96 = vector.load %arg8[%c0_39, %c0_40] : memref<16x128xf32, #tpu.memory_space<vmem>>, vector<8x128xf32>
    tpu.vector_store %arg8[%c0_39, %c0_40], %46 {strides = array<i32>} : memref<16x128xf32, #tpu.memory_space<vmem>>, vector<8x128xf32>,
    %c8 = arith.constant 8 : index
    %c0_41 = arith.constant 0 : index
    %97 = vector.load %arg8[%c8, %c0_41] : memref<16x128xf32, #tpu.memory_space<vmem>>, vector<8x128xf32>
    tpu.vector_store %arg8[%c8, %c0_41], %87 {strides = array<i32>} : memref<16x128xf32, #tpu.memory_space<vmem>>, vector<8x128xf32>,
    return
  }
}

</mosaic_0001>

<bundles_post_ra>
// kernel: tpu_custom_call.1
= control target key start
LH: loop header
LB: loop body
LE: loop exit
PB: predicated region body
PF: predicated region fallthrough
CT: control target
= control target key end

     0   :  { %15 = vsyncpa [#allocation3], 0  ;;  %s644_s0 = inlined_call_operand.hbm [shape: f32[8,32], index: 0, kind: input, shape index: {}]   ;;  %s645_s1 = inlined_call_operand.hbm [shape: f32[8,32], index: 1, kind: input, shape index: {}]   ;;  %s646_s2 = inlined_call_operand.hbm [shape: f32[32,128], index: 2, kind: input, shape index: {}]   ;;  %s647_s3 = inlined_call_operand.vmem [shape: f32[1,128], index: 3, kind: input, shape index: {}]   ;;  %s648_s4 = inlined_call_operand.vmem [shape: f32[1,128], index: 4, kind: input, shape index: {}]   ;;  %s649_s5 = inlined_call_operand.vmem [shape: f32[1,128], index: 5, kind: input, shape index: {}]   ;;  %s650_s6 = inlined_call_operand.hbm [shape: f32[128,128], index: 6, kind: input, shape index: {}]   ;;  %s651_s7 = inlined_call_operand.vmem [shape: f32[1,128], index: 7, kind: input, shape index: {}]   ;;  %s652_s8 = inlined_call_operand.hbm [shape: f32[16,128], index: 8, kind: output, shape index: {0}]   ;;  %s653_s9 = inlined_call_operand.hbm [shape: f32[1,1], index: 9, kind: output, shape index: {1}]  }
   0x1   :  { %16 = vsyncpa [#allocation6], 0 }
   0x2   :  { %17 = vsyncpa [#allocation9], 0 }
   0x3   :  { %18 = vsyncpa [#allocation4], 0  ;;  %s36_s11 = sshll.u32 %s645_s1, 4  ;;  %s37_s11 = int_to_ptr.hbm [resolvable:$true] %s36_s11 }
   0x4   :  { %19 = vsyncpa [#allocation12], 0  ;;  %s546_s12 = smov [#allocation5]   ;;  %s25_s16 = sshll.u32 %s644_s0, 4  ;;  %s26_s16 = int_to_ptr.hbm [resolvable:$true] %s25_s16 }
   0x5   :  { %s38_s13 = sshll.u32 %s546_s12, 4  ;;  %s547_s17 = smov [#allocation2]   ;;  %s39_s13 = int_to_ptr.vmem [resolvable:$true] %s38_s13 }
   0x6   :  { %41 = dma.hbm_to_vmem [thread:$0]  %s37_s11, 128, %s39_s13, [#allocation6]  }
   0x7   :  { %s27_s18 = sshll.u32 %s547_s17, 4  ;;  %s46_s21 = sshll.u32 %s646_s2, 4  ;;  %s28_s18 = int_to_ptr.vmem [resolvable:$true] %s27_s18  ;;  %s47_s21 = int_to_ptr.hbm [resolvable:$true] %s46_s21 }
   0x8   :  { %30 = dma.hbm_to_vmem [thread:$0]  %s26_s16, 128, %s28_s18, [#allocation3]  }
   0x9   :  { %s548_s1 = smov [#allocation7]   ;;  %s65_s25 = sshll.u32 %s650_s6, 4  ;;  %s66_s25 = int_to_ptr.hbm [resolvable:$true] %s65_s25 }
   0xa   :  { %s48_s22 = sshll.u32 %s548_s1, 4  ;;  %s549_s26 = smov 128   ;;  %s49_s22 = int_to_ptr.vmem [resolvable:$true] %s48_s22 }
   0xb   :  { %s550_s0 = smov 8   ;;  %s551_s27 = smov [#allocation8]  }
   0xc   :  { %54 = dma.hbm_to_vmem [thread:$0]  %s47_s21, 512, %s49_s22, [#allocation6], %s549_s26, %s549_s26, %s550_s0  }
   0xd   :  { %s67_s28 = sshll.u32 %s551_s27, 4  ;;  %s68_s28 = int_to_ptr.vmem [resolvable:$true] %s67_s28 }
   0xe   :  { %73 = dma.hbm_to_vmem [thread:$0]  %s66_s25, 2048, %s68_s28, [#allocation9], %s549_s26, %s549_s26, %s550_s0  }
   0xf   :  { %536 = dma.done.wait [#allocation3], 128  }
  0x10   :  { %537 = vsyncadd [#allocation3], 4294967168 }
  0x11   :  { %538 = dma.done.wait [#allocation6], 640  }
  0x12   :  { %539 = vsyncadd [#allocation6], 4294966656 }
  0x13   :  { %540 = dma.done.wait [#allocation9], 2048  }
  0x14   :  { %541 = vsyncadd [#allocation9], 4294965248  ;;  %v95_v0 = vld [vmem:[#allocation7 + $0x18] sm:$0xff]  ;;  %v94_v1 = vld [vmem:[#allocation7 + $0x10] sm:$0xff]  ;;  %vm120_vm0 = vcmask 261120   ;;  %v552_v6 = vmov 8.0  }
  0x15   :  { %136 = vmatpush.msra.mxu0 %v95_v0  ;;  %242 = vmatpush.msra.mxu2 %v95_v0  ;;  %v93_v2 = vld [vmem:[#allocation7 + $0x8] sm:$0xff]  ;;  %v92_v3 = vld [vmem:[#allocation7] sm:$0xff]  ;;  %v116_v4 = vld [vmem:[#allocation2] sm:$0xff]  ;;  %382 = vrcp.f32 %v552_v6  ;;  %s336_s12 = sshll.u32 %s652_s8, 4  ;;  %s553_s13 = smov [#allocation10]   ;;  %vm326_vm14 = vcmask 0   ;;  %s337_s12 = int_to_ptr.hbm [resolvable:$true] %s336_s12 }
  0x16   :  { %v226_v5 = vld [vmem:[#allocation5] sm:$0xff]  ;;  %v378_v9 = vld [vmem:[%s647_s3] ss:$0 sm:$0xff]  ;;  %v109_v16 = vld [vmem:[#allocation8 + $0x68] sm:$0xff]  ;;  %s334_s14 = sshll.u32 %s553_s13, 4  ;;  %s554_s15 = smov [#allocation11]   ;;  %s335_s14 = int_to_ptr.vmem [resolvable:$true] %s334_s14 }
  0x17   :  { %137 = vmatpush.msra.mxu0 %v94_v1  ;;  %243 = vmatpush.msra.mxu2 %v94_v1  ;;  %v111_v10 = vld [vmem:[#allocation8 + $0x78] sm:$0xff]  ;;  %v110_v14 = vld [vmem:[#allocation8 + $0x70] sm:$0xff]  ;;  %v108_v19 = vld [vmem:[#allocation8 + $0x60] sm:$0xff]  ;;  %s348_s16 = sshll.u32 %s554_s15, 4  ;;  %s350_s8 = sshll.u32 %s653_s9, 4  ;;  %s349_s16 = int_to_ptr.vmem [resolvable:$true] %s348_s16  ;;  %s351_s8 = int_to_ptr.hbm [resolvable:$true] %s350_s8 }
  0x18   :  { %191 = vmatpush.msra.mxu1 %v111_v10  ;;  %281 = vmatpush.msra.mxu3 %v111_v10  ;;  %v107_v23 = vld [vmem:[#allocation8 + $0x58] sm:$0xff]  ;;  %v106_v24 = vld [vmem:[#allocation8 + $0x50] sm:$0xff]  ;;  %v105_v28 = vld [vmem:[#allocation8 + $0x48] sm:$0xff] }
  0x19   :  { %138 = vmatpush.msra.mxu0 %v93_v2  ;;  %244 = vmatpush.msra.mxu2 %v93_v2  ;;  %v104_v31 = vld [vmem:[#allocation8 + $0x40] sm:$0xff]  ;;  %v103_v35 = vld [vmem:[#allocation8 + $0x38] sm:$0xff]  ;;  %v102_v38 = vld [vmem:[#allocation8 + $0x30] sm:$0xff] }
  0x1a   :  { %192 = vmatpush.msra.mxu1 %v110_v14  ;;  %282 = vmatpush.msra.mxu3 %v110_v14  ;;  %v101_v41 = vld [vmem:[#allocation8 + $0x28] sm:$0xff]  ;;  %v100_v44 = vld [vmem:[#allocation8 + $0x20] sm:$0xff]  ;;  %v99_v47 = vld [vmem:[#allocation8 + $0x18] sm:$0xff] }
  0x1b   :  { %139 = vmatpush.msra.mxu0 %v92_v3  ;;  %245 = vmatpush.msra.mxu2 %v92_v3  ;;  %v383_v7 = vpop.eup %382  ;;  %v98_v50 = vld [vmem:[#allocation8 + $0x10] sm:$0xff]  ;;  %v97_v53 = vld [vmem:[#allocation8 + $0x8] sm:$0xff]  ;;  %v96_v56 = vld [vmem:[#allocation8] sm:$0xff] }
  0x1c   :  { %367 = vmatmul.msk.f32.vlgmr.msra.gmra.mxu0 %vm120_vm0, %v116_v4  ;;  %368 = vmatmul.msk.f32.vlgmr.msra.gmra.mxu2 %vm120_vm0, %v226_v5  ;;  %v151_v8 = vmul.f32 8.0, %v383_v7  ;;  %vm155_vm1 = vweird.f32 %v383_v7 }
  0x1d   :  { %193 = vmatpush.msra.mxu1 %v109_v16  ;;  %283 = vmatpush.msra.mxu3 %v109_v16 }
  0x1e   :  { %v152_v12 = vsub.f32 1.0, %v151_v8 }
  0x1f   :  { %194 = vmatpush.msra.mxu1 %v108_v19  ;;  %284 = vmatpush.msra.mxu3 %v108_v19 }
  0x20   :  { %v153_v17 = vmul.f32 %v383_v7, %v152_v12 }
  0x21   :  { %195 = vmatpush.msra.mxu1 %v107_v23  ;;  %285 = vmatpush.msra.mxu3 %v107_v23 }
  0x22   :  { %v154_v25 = vadd.f32 %v383_v7, %v153_v17  ;;  %v380_v17 = vld [vmem:[%s649_s5] ss:$0 sm:$0xff] }
  0x23   :  { %196 = vmatpush.msra.mxu1 %v106_v24  ;;  %286 = vmatpush.msra.mxu3 %v106_v24 }
  0x24   :  { %v156_v32 = vsel %vm155_vm1, %v383_v7, %v154_v25 }
  0x25   :  { %197 = vmatpush.msra.mxu1 %v105_v28  ;;  %287 = vmatpush.msra.mxu3 %v105_v28  ;;  %v381_v28 = vld [vmem:[%s651_s7] ss:$0 sm:$0xff] }
  0x27   :  { %198 = vmatpush.msra.mxu1 %v104_v31  ;;  %288 = vmatpush.msra.mxu3 %v104_v31 }
  0x29   :  { %199 = vmatpush.msra.mxu1 %v103_v35  ;;  %289 = vmatpush.msra.mxu3 %v103_v35 }
  0x2b   :  { %200 = vmatpush.msra.mxu1 %v102_v38  ;;  %290 = vmatpush.msra.mxu3 %v102_v38 }
  0x2d   :  { %201 = vmatpush.msra.mxu1 %v101_v41  ;;  %291 = vmatpush.msra.mxu3 %v101_v41 }
  0x2f   :  { %202 = vmatpush.msra.mxu1 %v100_v44  ;;  %292 = vmatpush.msra.mxu3 %v100_v44 }
  0x31   :  { %203 = vmatpush.msra.mxu1 %v99_v47  ;;  %293 = vmatpush.msra.mxu3 %v99_v47 }
  0x33   :  { %204 = vmatpush.msra.mxu1 %v98_v50  ;;  %294 = vmatpush.msra.mxu3 %v98_v50 }
  0x35   :  { %205 = vmatpush.msra.mxu1 %v97_v53  ;;  %295 = vmatpush.msra.mxu3 %v97_v53 }
  0x37   :  { %206 = vmatpush.msra.mxu1 %v96_v56  ;;  %296 = vmatpush.msra.mxu3 %v96_v56 }
  0x99   :  { %v141_v11 = vpop.f32.mrf.mxu0 }
  0x9a   :  { %v142_v13 = vadd.f32 %v378_v9, %v141_v11 }
  0x9c   :  { %v144_v15 = vrot.slane %v142_v13, 4 }
  0x9e   :  { %v145_v18 = vadd.f32 %v144_v15, %v142_v13 }
  0x9f   :  { %v247_v20 = vpop.f32.mrf.mxu2 }
  0xa0   :  { %v146_v21 = vrot.slane %v145_v18, 2  ;;  %v248_v22 = vadd.f32 %v378_v9, %v247_v20 }
  0xa2   :  { %v147_v26 = vadd.f32 %v146_v21, %v145_v18  ;;  %v250_v27 = vrot.slane %v248_v22, 4 }
  0xa4   :  { %v148_v29 = vrot.slane %v147_v26, 1  ;;  %v251_v30 = vadd.f32 %v250_v27, %v248_v22 }
  0xa6   :  { %v149_v33 = vadd.f32 %v148_v29, %v147_v26  ;;  %v252_v34 = vrot.slane %v251_v30, 2 }
  0xa8   :  { %v157_v36 = vmul.f32 %v156_v32, %v149_v33  ;;  %v253_v37 = vadd.f32 %v252_v34, %v251_v30 }
  0xaa   :  { %v158_v39 = vsub.f32 %v142_v13, %v157_v36  ;;  %v254_v40 = vrot.slane %v253_v37, 1  ;;  %v379_v13 = vld [vmem:[%s648_s4] ss:$0 sm:$0xff] }
  0xac   :  { %v159_v42 = vmul.f32 %v158_v39, %v158_v39  ;;  %v255_v43 = vadd.f32 %v254_v40, %v253_v37 }
  0xae   :  { %v160_v45 = vrot.slane %v159_v42, 4  ;;  %v256_v46 = vmul.f32 %v255_v43, %v156_v32 }
  0xb0   :  { %v161_v48 = vadd.f32 %v160_v45, %v159_v42  ;;  %v257_v49 = vsub.f32 %v248_v22, %v256_v46 }
  0xb2   :  { %v162_v51 = vrot.slane %v161_v48, 2  ;;  %v258_v52 = vmul.f32 %v257_v49, %v257_v49 }
  0xb4   :  { %v163_v54 = vadd.f32 %v162_v51, %v161_v48  ;;  %v259_v55 = vrot.slane %v258_v52, 4 }
  0xb6   :  { %v164_v57 = vrot.slane %v163_v54, 1  ;;  %v260_v58 = vadd.f32 %v259_v55, %v258_v52 }
  0xb8   :  { %v165_v59 = vadd.f32 %v164_v57, %v163_v54  ;;  %v261_v60 = vrot.slane %v260_v58, 2 }
  0xba   :  { %v166_v61 = vmul.f32 %v165_v59, %v156_v32  ;;  %v262_v62 = vadd.f32 %v261_v60, %v260_v58 }
  0xbc   :  { %v263_v63 = vrot.slane %v262_v62, 1  ;;  %v167_v0 = vadd.f32 1e-05, %v166_v61 }
  0xbe   :  { %v264_v1 = vadd.f32 %v263_v63, %v262_v62  ;;  %384 = vrsqrt.f32 %v167_v0  ;;  %vm174_vm3 = vweird.f32 %v167_v0 }
  0xc0   :  { %v265_v2 = vmul.f32 %v264_v1, %v156_v32 }
  0xc2   :  { %v266_v3 = vadd.f32 1e-05, %v265_v2 }
  0xc4   :  { %v385_v4 = vpop.eup %384  ;;  %386 = vrsqrt.f32 %v266_v3  ;;  %vm273_vm6 = vweird.f32 %v266_v3 }
  0xc5   :  { %v169_v5 = vmul.f32 %v385_v4, %v167_v0  ;;  %vm175_vm2 = vweird.f32 %v385_v4 }
  0xc6   :  { %vm176_vm4 = vmor %vm174_vm3, %vm175_vm2 }
  0xc7   :  { %v170_v6 = vmul.f32 %v385_v4, %v169_v5 }
  0xc9   :  { %v171_v7 = vmul.f32 0.5, %v170_v6 }
  0xca   :  { %v387_v8 = vpop.eup %386 }
  0xcb   :  { %v172_v9 = vsub.f32 1.5, %v171_v7  ;;  %v268_v10 = vmul.f32 %v387_v8, %v266_v3  ;;  %vm274_vm5 = vweird.f32 %v387_v8 }
  0xcc   :  { %vm275_vm7 = vmor %vm273_vm6, %vm274_vm5 }
  0xcd   :  { %v173_v11 = vmul.f32 %v385_v4, %v172_v9  ;;  %v269_v12 = vmul.f32 %v387_v8, %v268_v10 }
  0xcf   :  { %v177_v14 = vsel %vm176_vm4, %v385_v4, %v173_v11  ;;  %v270_v15 = vmul.f32 0.5, %v269_v12 }
  0xd0   :  { %v178_v16 = vmul.f32 %v177_v14, %v158_v39 }
  0xd1   :  { %v271_v18 = vsub.f32 1.5, %v270_v15 }
  0xd2   :  { %v182_v19 = vmul.f32 %v379_v13, %v178_v16 }
  0xd3   :  { %v272_v20 = vmul.f32 %v387_v8, %v271_v18 }
  0xd4   :  { %v186_v21 = vadd.f32 %v380_v17, %v182_v19 }
  0xd5   :  { %v276_v22 = vsel %vm275_vm7, %v387_v8, %v272_v20 }
  0xd6   :  { %v187_v23 = vmax.f32 %v186_v21, 0.0  ;;  %v277_v24 = vmul.f32 %v276_v22, %v257_v49 }
  0xd8   :  { %207 = vmatmul.f32.vlgmr.msra.gmra.mxu1 %v187_v23  ;;  %v278_v25 = vmul.f32 %v379_v13, %v277_v24 }
  0xda   :  { %v279_v26 = vadd.f32 %v380_v17, %v278_v25 }
  0xdc   :  { %v280_v27 = vmax.f32 %v279_v26, 0.0 }
  0xde   :  { %297 = vmatmul.f32.vlgmr.msra.gmra.mxu3 %v280_v27 }
 0x155   :  { %v208_v29 = vpop.f32.mrf.mxu1 }
 0x156   :  { %v209_v30 = vadd.f32 %v381_v28, %v208_v29 }
 0x158   :  { %v211_v31 = vmul.f32 %v209_v30, %v209_v30 }
 0x15a   :  { %212 = vadd.xlane.f32.xlu0 %v211_v31 }
 0x161   :  { %v298_v32 = vpop.f32.mrf.mxu3 }
 0x162   :  { %v299_v33 = vadd.f32 %v381_v28, %v298_v32 }
 0x164   :  { %v301_v34 = vmul.f32 %v299_v33, %v299_v33 }
 0x166   :  { %302 = vadd.xlane.f32.xlu0 %v301_v34 }
 0x1cd   :  { %v213_v35 = vpop.xlane.xlu0 %212 }
 0x1ce   :  { %v214_v36 = vmax.f32 %v213_v35, 1e-24 }
 0x1d0   :  { %388 = vrsqrt.f32 %v214_v36  ;;  %vm221_vm9 = vweird.f32 %v214_v36 }
 0x1d6   :  { %v389_v37 = vpop.eup %388 }
 0x1d7   :  { %v216_v38 = vmul.f32 %v389_v37, %v214_v36  ;;  %vm222_vm8 = vweird.f32 %v389_v37 }
 0x1d8   :  { %vm223_vm10 = vmor %vm221_vm9, %vm222_vm8 }
 0x1d9   :  { %v217_v39 = vmul.f32 %v389_v37, %v216_v38  ;;  %v303_v40 = vpop.xlane.xlu0 %302 }
 0x1da   :  { %v304_v41 = vmax.f32 %v303_v40, 1e-24 }
 0x1db   :  { %v218_v42 = vmul.f32 0.5, %v217_v39 }
 0x1dc   :  { %390 = vrsqrt.f32 %v304_v41  ;;  %vm311_vm12 = vweird.f32 %v304_v41 }
 0x1dd   :  { %v219_v43 = vsub.f32 1.5, %v218_v42 }
 0x1df   :  { %v220_v44 = vmul.f32 %v389_v37, %v219_v43 }
 0x1e1   :  { %v224_v45 = vsel %vm223_vm10, %v389_v37, %v220_v44 }
 0x1e2   :  { %v391_v46 = vpop.eup %390  ;;  %v225_v47 = vmul.f32 %v224_v45, %v209_v30 }
 0x1e3   :  { %v306_v48 = vmul.f32 %v391_v46, %v304_v41  ;;  %vm312_vm11 = vweird.f32 %v391_v46 }
 0x1e4   :  { %328 = vst [vmem:[#allocation10] sm:$0xff] %v225_v47  ;;  %vm313_vm13 = vmor %vm311_vm12, %vm312_vm11 }
 0x1e5   :  { %v307_v49 = vmul.f32 %v391_v46, %v306_v48 }
 0x1e7   :  { %v308_v50 = vmul.f32 0.5, %v307_v49 }
 0x1e9   :  { %v309_v51 = vsub.f32 1.5, %v308_v50 }
 0x1eb   :  { %v310_v52 = vmul.f32 %v391_v46, %v309_v51 }
 0x1ed   :  { %v314_v53 = vsel %vm313_vm13, %v391_v46, %v310_v52 }
 0x1ee   :  { %v315_v54 = vmul.f32 %v314_v53, %v299_v33 }
 0x1f0   :  { %v316_v55 = vmul.f32 %v315_v54, %v225_v47  ;;  %329 = vst [vmem:[#allocation10 + $0x8] sm:$0xff] %v315_v54 }
 0x1f1   :  { %342 = dma.vmem_to_hbm [thread:$0]  %s335_s14, 256, %s337_s12, [#allocation4], %s549_s26, %s549_s26, %s550_s0  }
 0x1f2   :  { %317 = vadd.xlane.f32.xlu1 %v316_v55 }
 0x265   :  { %v318_v56 = vpop.xlane.xlu1 %317 }
 0x266   :  { %v319_v57 = vrot.slane %v318_v56, 4 }
 0x268   :  { %v320_v58 = vadd.f32 %v319_v57, %v318_v56 }
 0x26a   :  { %v321_v59 = vrot.slane %v320_v58, 2 }
 0x26c   :  { %v322_v60 = vadd.f32 %v321_v59, %v320_v58 }
 0x26e   :  { %v323_v61 = vrot.slane %v322_v60, 1 }
 0x270   :  { %v324_v62 = vadd.f32 %v323_v61, %v322_v60 }
 0x272   :  { %v325_v63 = vmul.f32 2.0, %v324_v62 }
 0x274   :  { %327 = vst.msk [vmem:[#allocation11] sm:$0x1] %vm326_vm14, %v325_v63 }
 0x275   :  { %353 = dma.vmem_to_hbm [thread:$0]  %s349_s16, 16, %s351_s8, [#allocation12]  }
 0x276   :  { %542 = dma.done.wait [#allocation4], 256  }
 0x277   :  { %543 = vsyncadd [#allocation4], 4294967040 }
 0x278   :  { %544 = dma.done.wait [#allocation12], 16  }
 0x279   :  { %545 = vsyncadd [#allocation12], 4294967280 }
 0x27a   :  { %362 = vsyncpa [#allocation3], 1 }
 0x27b   :  { %363 = vsyncpa [#allocation6], 1 }
 0x27c   :  { %364 = vsyncpa [#allocation9], 1 }
 0x27d   :  { %365 = vsyncpa [#allocation4], 1 }
 0x27e   :  { %366 = vsyncpa [#allocation12], 1 }

</bundles_post_ra>
